<compile_context>
chip_gen: v5e
topology: v5e:2x2
jax: 0.10.0
libtpu: 0.0.40
codegen_flags: <defaults>
</compile_context>

<pallas_src>
import functools

import jax
import jax.numpy as jnp
from jax import lax
from jax.experimental import pallas as pl
from jax.experimental.pallas import tpu as pltpu


def _disp_kernel(x_ref, w1_ref, b1_ref, w2_ref, b2_ref,
                 w3_ref, b3_ref, w4_ref, b4_ref, o_ref, *, sub_n, n_sub):
    # Weights (bf16) are tiny and resident; load once per tile.
    w1 = w1_ref[...]
    w2 = w2_ref[...]
    w3 = w3_ref[...]
    w4 = w4_ref[...]

    # Hoist the lane-broadcast of the biases out of the unrolled sub-tile loop
    # (JAX does not CSE broadcast_in_dim; in-loop adds would redo it n_sub times).
    b1 = jnp.broadcast_to(b1_ref[...], (w1.shape[0], sub_n))
    b2 = jnp.broadcast_to(b2_ref[...], (w2.shape[0], sub_n))
    b3 = jnp.broadcast_to(b3_ref[...], (w3.shape[0], sub_n))
    b4 = jnp.broadcast_to(b4_ref[...], (w4.shape[0], sub_n))

    def body(i, carry):
        s = pl.multiple_of(i * sub_n, sub_n)

        # (C_in, sub_n) activation sub-tile; cast to bf16 for the MXU only if the
        # producer handed us a wider dtype (bf16 inputs pass through untouched).
        x = x_ref[0, :, pl.ds(s, sub_n)]
        if x.dtype != jnp.bfloat16:
            x = x.astype(jnp.bfloat16)

        # conv1 + ReLU : (64, C_in) @ (C_in, sub_n) -> (64, sub_n)
        h = jnp.dot(w1, x, preferred_element_type=jnp.float32)
        h = jnp.maximum(h + b1, 0.0).astype(jnp.bfloat16)

        # conv2 + ReLU : (32, 64) @ (64, sub_n) -> (32, sub_n)
        h = jnp.dot(w2, h, preferred_element_type=jnp.float32)
        h = jnp.maximum(h + b2, 0.0).astype(jnp.bfloat16)

        # conv3 + ReLU : (16, 32) @ (32, sub_n) -> (16, sub_n)
        h = jnp.dot(w3, h, preferred_element_type=jnp.float32)
        h = jnp.maximum(h + b3, 0.0).astype(jnp.bfloat16)

        # conv4 (no activation) : (3, 16) @ (16, sub_n) -> (3, sub_n)
        out = jnp.dot(w4, h, preferred_element_type=jnp.float32) + b4

        o_ref[0, :, pl.ds(s, sub_n)] = out.astype(o_ref.dtype)
        return carry

    lax.fori_loop(0, n_sub, body, 0, unroll=True)


def augmentor_displacement(x, params, *, tile_n=8192, sub_n=256):
    """x: (B, C_in, N) float32 or bfloat16. Returns (B, 3, N) float32."""
    B, C_in, N = x.shape
    w1, b1, w2, b2, w3, b3, w4, b4 = params
    assert w1.shape[1] == C_in
    assert sub_n % 128 == 0 and tile_n % sub_n == 0

    # --- tile selection -----------------------------------------------------
    # Work in units of sub_n-wide sub-tiles; clamp the outer tile to the point
    # count and make sure the parallel grid keeps >= 2 points when possible so
    # both v7x TensorCores are busy (v5e/v6e are unaffected).
    n_sub_total = pl.cdiv(N, sub_n)
    tile_subs = max(1, min(tile_n // sub_n, n_sub_total))
    n_tiles = pl.cdiv(n_sub_total, tile_subs)
    if B * n_tiles < 2 and n_sub_total >= 2:
        tile_subs = pl.cdiv(n_sub_total, 2)
        n_tiles = pl.cdiv(n_sub_total, tile_subs)
    tile_n = tile_subs * sub_n
    n_sub = tile_subs

    # bf16 weights for the MXU; biases stay f32 (bias-add / ReLU on the f32 VPU path).
    w1b, w2b, w3b, w4b = (w.astype(jnp.bfloat16) for w in (w1, w2, w3, w4))
    b1f, b2f, b3f, b4f = (b.astype(jnp.float32).reshape(-1, 1) for b in (b1, b2, b3, b4))

    grid = (B, n_tiles)

    def wspec(shape):
        # full (untiled) weight/bias block; identical for every grid step -> fetched once.
        return pl.BlockSpec(shape, lambda b, n: (0,) * len(shape))

    kernel = functools.partial(_disp_kernel, sub_n=sub_n, n_sub=n_sub)

    # VMEM budget from the actual footprint (double-buffered x / out tiles + weights),
    # with generous slack; capped below v7x's 64 MiB physical VMEM.
    weight_bytes = sum(int(a.size) * a.dtype.itemsize
                       for a in (w1b, b1f, w2b, b2f, w3b, b3f, w4b, b4f))
    vmem_needed = (2 * C_in * tile_n * x.dtype.itemsize
                   + 2 * 3 * tile_n * 4
                   + 2 * weight_bytes)
    vmem_limit = int(min(max(2 * vmem_needed, 16 << 20) + (8 << 20), 64 << 20))

    out = pl.pallas_call(
        kernel,
        out_shape=jax.ShapeDtypeStruct((B, 3, N), jnp.float32),
        grid_spec=pltpu.PrefetchScalarGridSpec(
            num_scalar_prefetch=0,
            grid=grid,
            in_specs=[
                pl.BlockSpec((1, C_in, tile_n), lambda b, n: (b, 0, n)),
                wspec(w1b.shape), wspec(b1f.shape),
                wspec(w2b.shape), wspec(b2f.shape),
                wspec(w3b.shape), wspec(b3f.shape),
                wspec(w4b.shape), wspec(b4f.shape),
            ],
            out_specs=pl.BlockSpec((1, 3, tile_n), lambda b, n: (b, 0, n)),
        ),
        compiler_params=pltpu.CompilerParams(
            dimension_semantics=("parallel", "parallel"),
            vmem_limit_bytes=vmem_limit),
    )(x, w1b, b1f, w2b, b2f, w3b, b3f, w4b, b4f)

    return out


def init_params(dim, key):
    """Synthetic init matching the Conv1d shapes of the module.

    Conv1d(in, out, 1) weight is (out, in, 1) in PyTorch; kernel-size-1 collapses
    to (out, in). Biases are kept as (out, 1) so they broadcast over N.
    """
    c_in = dim + 64 + 64
    dims = [(64, c_in), (32, 64), (16, 32), (3, 16)]
    params = []
    for (out_c, in_c) in dims:
        key, kw, kb = jax.random.split(key, 3)
        bound = 1.0 / jnp.sqrt(in_c)
        w = jax.random.uniform(kw, (out_c, in_c), jnp.float32, -bound, bound)
        b = jax.random.uniform(kb, (out_c, 1), jnp.float32, -bound, bound)
        params += [w, b]
    return params


def reference(x, params):
    w1, b1, w2, b2, w3, b3, w4, b4 = params
    h = jnp.maximum(jnp.einsum('oc,bcn->bon', w1, x) + b1[None], 0.0)
    h = jnp.maximum(jnp.einsum('oc,bcn->bon', w2, h) + b2[None], 0.0)
    h = jnp.maximum(jnp.einsum('oc,bcn->bon', w3, h) + b3[None], 0.0)
    return jnp.einsum('oc,bcn->bon', w4, h) + b4[None]


if __name__ == "__main__":
    key = jax.random.PRNGKey(0)
    dim = 3                       # point dim -> conv1 input channels = dim + 64 + 64 = 131
    c_in = dim + 64 + 64
    B = 2

    key, kx1, kx2, kp = jax.random.split(key, 4)
    params = init_params(dim, kp)

    # Case 1: N a multiple of the sub-tile (single sub-tile, exact block).
    N1 = 256
    x1 = jax.random.normal(kx1, (B, c_in, N1), jnp.float32)
    out1 = jax.block_until_ready(augmentor_displacement(x1, params))
    ref1 = reference(x1, params)
    assert out1.shape == (B, 3, N1)
    assert jnp.allclose(out1, ref1, atol=3e-2, rtol=3e-2), "mismatch vs reference (N=256)"

    # Case 2: ragged N spanning several sub-tiles (exercises the inner unrolled loop
    # and the Pallas trailing-partial-block path — no host-side pad/slice).
    N2 = 640
    x2 = jax.random.normal(kx2, (B, c_in, N2), jnp.float32)
    out2 = jax.block_until_ready(augmentor_displacement(x2, params))
    ref2 = reference(x2, params)
    assert out2.shape == (B, 3, N2)
    assert jnp.allclose(out2, ref2, atol=3e-2, rtol=3e-2), "mismatch vs reference (N=640)"

    print("KERNEL_OK")
</pallas_src>

<mosaic_0001>
module attributes {stable_mosaic.version = 11 : i64} {
  func.func @_disp_kernel(%arg0: i32, %arg1: i32, %arg2: memref<1x131x256xf32, #tpu.memory_space<vmem>>, %arg3: memref<64x131xbf16, #tpu.memory_space<vmem>>, %arg4: memref<64x1xf32, #tpu.memory_space<vmem>>, %arg5: memref<32x64xbf16, #tpu.memory_space<vmem>>, %arg6: memref<32x1xf32, #tpu.memory_space<vmem>>, %arg7: memref<16x32xbf16, #tpu.memory_space<vmem>>, %arg8: memref<16x1xf32, #tpu.memory_space<vmem>>, %arg9: memref<3x16xbf16, #tpu.memory_space<vmem>>, %arg10: memref<3x1xf32, #tpu.memory_space<vmem>>, %arg11: memref<1x3x256xf32, #tpu.memory_space<vmem>>) attributes {dimension_semantics = [#tpu.dimension_semantics<parallel>, #tpu.dimension_semantics<parallel>], iteration_bounds = array<i64: 2, 1>, scalar_prefetch = 0 : i64, scratch_operands = 0 : i64, tpu.core_type = #tpu.core_type<tc>, window_params = [{transform_indices = @transform_0, window_bounds = array<i64: 1, 131, 256>}, {pipeline_mode = #tpu.pipeline_mode<synchronous>, transform_indices = @transform_1, window_bounds = array<i64: 64, 131>}, {pipeline_mode = #tpu.pipeline_mode<synchronous>, transform_indices = @transform_2, window_bounds = array<i64: 64, 1>}, {pipeline_mode = #tpu.pipeline_mode<synchronous>, transform_indices = @transform_3, window_bounds = array<i64: 32, 64>}, {pipeline_mode = #tpu.pipeline_mode<synchronous>, transform_indices = @transform_4, window_bounds = array<i64: 32, 1>}, {pipeline_mode = #tpu.pipeline_mode<synchronous>, transform_indices = @transform_5, window_bounds = array<i64: 16, 32>}, {pipeline_mode = #tpu.pipeline_mode<synchronous>, transform_indices = @transform_6, window_bounds = array<i64: 16, 1>}, {pipeline_mode = #tpu.pipeline_mode<synchronous>, transform_indices = @transform_7, window_bounds = array<i64: 3, 16>}, {pipeline_mode = #tpu.pipeline_mode<synchronous>, transform_indices = @transform_8, window_bounds = array<i64: 3, 1>}, {transform_indices = @transform_9, window_bounds = array<i64: 1, 3, 256>}]} {
    %c0 = arith.constant 0 : index
    %c0_0 = arith.constant 0 : index
    %0 = vector.load %arg3[%c0, %c0_0] : memref<64x131xbf16, #tpu.memory_space<vmem>>, vector<64x131xbf16>
    %c0_1 = arith.constant 0 : index
    %c0_2 = arith.constant 0 : index
    %1 = vector.load %arg5[%c0_1, %c0_2] : memref<32x64xbf16, #tpu.memory_space<vmem>>, vector<32x64xbf16>
    %c0_3 = arith.constant 0 : index
    %c0_4 = arith.constant 0 : index
    %2 = vector.load %arg7[%c0_3, %c0_4] : memref<16x32xbf16, #tpu.memory_space<vmem>>, vector<16x32xbf16>
    %c0_5 = arith.constant 0 : index
    %c0_6 = arith.constant 0 : index
    %3 = vector.load %arg9[%c0_5, %c0_6] : memref<3x16xbf16, #tpu.memory_space<vmem>>, vector<3x16xbf16>
    %c0_7 = arith.constant 0 : index
    %c0_8 = arith.constant 0 : index
    %4 = vector.load %arg4[%c0_7, %c0_8] : memref<64x1xf32, #tpu.memory_space<vmem>>, vector<64x1xf32>
    %5 = vector.shape_cast %4 : vector<64x1xf32> to vector<64x1xf32>
    %6 = vector.broadcast %5 : vector<64x1xf32> to vector<64x256xf32>
    %c0_9 = arith.constant 0 : index
    %c0_10 = arith.constant 0 : index
    %7 = vector.load %arg6[%c0_9, %c0_10] : memref<32x1xf32, #tpu.memory_space<vmem>>, vector<32x1xf32>
    %8 = vector.shape_cast %7 : vector<32x1xf32> to vector<32x1xf32>
    %9 = vector.broadcast %8 : vector<32x1xf32> to vector<32x256xf32>
    %c0_11 = arith.constant 0 : index
    %c0_12 = arith.constant 0 : index
    %10 = vector.load %arg8[%c0_11, %c0_12] : memref<16x1xf32, #tpu.memory_space<vmem>>, vector<16x1xf32>
    %11 = vector.shape_cast %10 : vector<16x1xf32> to vector<16x1xf32>
    %12 = vector.broadcast %11 : vector<16x1xf32> to vector<16x256xf32>
    %c0_13 = arith.constant 0 : index
    %c0_14 = arith.constant 0 : index
    %13 = vector.load %arg10[%c0_13, %c0_14] : memref<3x1xf32, #tpu.memory_space<vmem>>, vector<3x1xf32>
    %14 = vector.shape_cast %13 : vector<3x1xf32> to vector<3x1xf32>
    %15 = vector.broadcast %14 : vector<3x1xf32> to vector<3x256xf32>
    %c0_i32 = arith.constant 0 : i32
    %c256_i32 = arith.constant 256 : i32
    %16 = arith.muli %c0_i32, %c256_i32 : i32
    %17 = tpu.assume_multiple %16, 256 : i32
    %c0_15 = arith.constant 0 : index
    %c0_16 = arith.constant 0 : index
    %18 = arith.index_cast %17 : i32 to index
    %19 = vector.load %arg2[%c0_15, %c0_16, %18] : memref<1x131x256xf32, #tpu.memory_space<vmem>>, vector<1x131x256xf32>
    %20 = vector.shape_cast %19 : vector<1x131x256xf32> to vector<131x256xf32>
    %21 = arith.truncf %20 : vector<131x256xf32> to vector<131x256xbf16>
    %cst = arith.constant dense<0.000000e+00> : vector<64x256xf32>
    %22 = tpu.matmul %0, %21, %cst {dimension_numbers = #tpu.dot_dimension_numbers<[1], [0], [0], [1], [0, 0, 1, 1], [], []>} : vector<64x131xbf16>, vector<131x256xbf16>, vector<64x256xf32> -> vector<64x256xf32>
    %23 = arith.addf %22, %6 : vector<64x256xf32>
    %cst_17 = arith.constant 0.000000e+00 : f32
    %24 = vector.broadcast %cst_17 : f32 to vector<64x256xf32>
    %25 = arith.maximumf %23, %24 : vector<64x256xf32>
    %26 = arith.truncf %25 : vector<64x256xf32> to vector<64x256xbf16>
    %cst_18 = arith.constant dense<0.000000e+00> : vector<32x256xf32>
    %27 = tpu.matmul %1, %26, %cst_18 {dimension_numbers = #tpu.dot_dimension_numbers<[1], [0], [0], [1], [0, 0, 1, 1], [], []>} : vector<32x64xbf16>, vector<64x256xbf16>, vector<32x256xf32> -> vector<32x256xf32>
    %28 = arith.addf %27, %9 : vector<32x256xf32>
    %cst_19 = arith.constant 0.000000e+00 : f32
    %29 = vector.broadcast %cst_19 : f32 to vector<32x256xf32>
    %30 = arith.maximumf %28, %29 : vector<32x256xf32>
    %31 = arith.truncf %30 : vector<32x256xf32> to vector<32x256xbf16>
    %cst_20 = arith.constant dense<0.000000e+00> : vector<16x256xf32>
    %32 = tpu.matmul %2, %31, %cst_20 {dimension_numbers = #tpu.dot_dimension_numbers<[1], [0], [0], [1], [0, 0, 1, 1], [], []>} : vector<16x32xbf16>, vector<32x256xbf16>, vector<16x256xf32> -> vector<16x256xf32>
    %33 = arith.addf %32, %12 : vector<16x256xf32>
    %cst_21 = arith.constant 0.000000e+00 : f32
    %34 = vector.broadcast %cst_21 : f32 to vector<16x256xf32>
    %35 = arith.maximumf %33, %34 : vector<16x256xf32>
    %36 = arith.truncf %35 : vector<16x256xf32> to vector<16x256xbf16>
    %cst_22 = arith.constant dense<0.000000e+00> : vector<3x256xf32>
    %37 = tpu.matmul %3, %36, %cst_22 {dimension_numbers = #tpu.dot_dimension_numbers<[1], [0], [0], [1], [0, 0, 1, 1], [], []>} : vector<3x16xbf16>, vector<16x256xbf16>, vector<3x256xf32> -> vector<3x256xf32>
    %38 = arith.addf %37, %15 : vector<3x256xf32>
    %c0_23 = arith.constant 0 : index
    %c0_24 = arith.constant 0 : index
    %39 = arith.index_cast %17 : i32 to index
    %40 = vector.load %arg11[%c0_23, %c0_24, %39] : memref<1x3x256xf32, #tpu.memory_space<vmem>>, vector<1x3x256xf32>
    %41 = vector.shape_cast %40 : vector<1x3x256xf32> to vector<3x256xf32>
    %42 = vector.shape_cast %38 : vector<3x256xf32> to vector<1x3x256xf32>
    tpu.vector_store %arg11[%c0_23, %c0_24, %39], %42 {strides = array<i32>} : memref<1x3x256xf32, #tpu.memory_space<vmem>>, vector<1x3x256xf32>,
    %c1_i32 = arith.constant 1 : i32
    return
  }
  func.func @transform_0(%arg0: i32, %arg1: i32) -> (i32, i32, i32) {
    %c0_i32 = arith.constant 0 : i32
    %c0_i32_0 = arith.constant 0 : i32
    return %arg0, %c0_i32, %arg1 : i32, i32, i32
  }
  func.func @transform_1(%arg0: i32, %arg1: i32) -> (i32, i32) {
    %c0_i32 = arith.constant 0 : i32
    %c0_i32_0 = arith.constant 0 : i32
    %c0_i32_1 = arith.constant 0 : i32
    return %c0_i32, %c0_i32_0 : i32, i32
  }
  func.func @transform_2(%arg0: i32, %arg1: i32) -> (i32, i32) {
    %c0_i32 = arith.constant 0 : i32
    %c0_i32_0 = arith.constant 0 : i32
    %c0_i32_1 = arith.constant 0 : i32
    return %c0_i32, %c0_i32_0 : i32, i32
  }
  func.func @transform_3(%arg0: i32, %arg1: i32) -> (i32, i32) {
    %c0_i32 = arith.constant 0 : i32
    %c0_i32_0 = arith.constant 0 : i32
    %c0_i32_1 = arith.constant 0 : i32
    return %c0_i32, %c0_i32_0 : i32, i32
  }
  func.func @transform_4(%arg0: i32, %arg1: i32) -> (i32, i32) {
    %c0_i32 = arith.constant 0 : i32
    %c0_i32_0 = arith.constant 0 : i32
    %c0_i32_1 = arith.constant 0 : i32
    return %c0_i32, %c0_i32_0 : i32, i32
  }
  func.func @transform_5(%arg0: i32, %arg1: i32) -> (i32, i32) {
    %c0_i32 = arith.constant 0 : i32
    %c0_i32_0 = arith.constant 0 : i32
    %c0_i32_1 = arith.constant 0 : i32
    return %c0_i32, %c0_i32_0 : i32, i32
  }
  func.func @transform_6(%arg0: i32, %arg1: i32) -> (i32, i32) {
    %c0_i32 = arith.constant 0 : i32
    %c0_i32_0 = arith.constant 0 : i32
    %c0_i32_1 = arith.constant 0 : i32
    return %c0_i32, %c0_i32_0 : i32, i32
  }
  func.func @transform_7(%arg0: i32, %arg1: i32) -> (i32, i32) {
    %c0_i32 = arith.constant 0 : i32
    %c0_i32_0 = arith.constant 0 : i32
    %c0_i32_1 = arith.constant 0 : i32
    return %c0_i32, %c0_i32_0 : i32, i32
  }
  func.func @transform_8(%arg0: i32, %arg1: i32) -> (i32, i32) {
    %c0_i32 = arith.constant 0 : i32
    %c0_i32_0 = arith.constant 0 : i32
    %c0_i32_1 = arith.constant 0 : i32
    return %c0_i32, %c0_i32_0 : i32, i32
  }
  func.func @transform_9(%arg0: i32, %arg1: i32) -> (i32, i32, i32) {
    %c0_i32 = arith.constant 0 : i32
    %c0_i32_0 = arith.constant 0 : i32
    return %arg0, %c0_i32, %arg1 : i32, i32, i32
  }
}

</mosaic_0001>

<bundles_post_ra>
// kernel: tpu_custom_call.1
= control target key start
LH: loop header
LB: loop body
LE: loop exit
PB: predicated region body
PF: predicated region fallthrough
CT: control target
= control target key end

     0   :  { %s1151_s30 = smov 0   ;;  %s1153_s10 = smov 0   ;;  %s1359_s0 = inlined_call_operand.vmem [shape: f32[2,131,256], index: 0, kind: input, shape index: {}]   ;;  %s1360_s1 = inlined_call_operand.vmem [shape: bf16[64,131], index: 1, kind: input, shape index: {}]   ;;  %s1361_s2 = inlined_call_operand.vmem [shape: f32[64,1], index: 2, kind: input, shape index: {}]   ;;  %s1362_s3 = inlined_call_operand.vmem [shape: bf16[32,64], index: 3, kind: input, shape index: {}]   ;;  %s1363_s4 = inlined_call_operand.vmem [shape: f32[32,1], index: 4, kind: input, shape index: {}]   ;;  %s1364_s5 = inlined_call_operand.vmem [shape: bf16[16,32], index: 5, kind: input, shape index: {}]   ;;  %s1365_s6 = inlined_call_operand.vmem [shape: f32[16,1], index: 6, kind: input, shape index: {}]   ;;  %s1366_s7 = inlined_call_operand.vmem [shape: bf16[3,16], index: 7, kind: input, shape index: {}]   ;;  %s1367_s8 = inlined_call_operand.vmem [shape: f32[3,1], index: 8, kind: input, shape index: {}]   ;;  %s1368_s9 = inlined_call_operand.vmem [shape: f32[2,3,256], index: 9, kind: output, shape index: {}]  }
   0x1   :  { %s1155_s11 = smov 0  }
   0x2 LB: > { %s31_s12 = sadd.s32 1, %s1093_s10  ;;  %p967_p0 = scmp.ge.s32.totalorder %s1097_s11, 1  ;;  %s1097_s11 = sphi %s1155_s11, %s19_s11   ;;  %s1093_s10 = sphi %s1153_s10, %s1370_s10   ;;  %s1089_s30 = sphi %s1151_s30, %s1369_s30  }
   0x3   : > { %p33_p1 = scmp.ge.s32.totalorder %s31_s12, 2  ;;  %p308_p2 = scmp.lt.s32.totalorder %s1097_s11, 3 }
   0x5   : > { %s1372_s12 = smov (%p33_p1, %s31_s12), 0  ;;  %p309_p3 = pnand %p967_p0, %p308_p2 }
   0x6   : > { %p353_p4 = scmp.lt.s32.totalorder (!%p309_p3), %s1089_s30, 1 }
   0x7   : > { %312 = sbr.rel (%p309_p3) target bundleno = 720 (0x2d0), region = 56 }
   0xc   : > { %s1374_s30 = smov (!%p353_p4, %s1089_s30), 1  ;;  %v1099_v7 = vmov 0   ;;  %vm579_vm0 = vcmask 1040384   ;;  %vm580_vm1 = vcmask 1041408   ;;  %v1100_v17 = vmov 65535   ;;  %v394_v38 = vld [vmem:[%s1361_s2 + $0x30] sm:$0xff] }
   0xd   : > { %s1045_s13 = smul.u32 272, %s1374_s30  ;;  %1072 = vset.pattern.permute.xlu0 %v1099_v7  ;;  %1073 = vset.pattern.permute.xlu1 %v1099_v7  ;;  %v581_v18 = vsel %vm579_vm0, 4294967295, %v1100_v17  ;;  %v1034_v20 = vld [vmem:[%s1360_s1 + $0x4] sm:$0xf]  ;;  %v975_v29 = vld [vmem:[%s1360_s1 + $0x8] sm:$0xf0] }
   0xe   : > { %1074 = vset.pattern.permute.xlu2 %v1099_v7  ;;  %v582_v25 = vsel %vm580_vm1, %v581_v18, 0  ;;  %v978_v36 = vor.u32 %v1034_v20, %v975_v29  ;;  %v392_v39 = vld [vmem:[%s1361_s2 + $0x20] sm:$0xff]  ;;  %vm566_vm2 = vcmask 23552   ;;  %428 = vperm.xlu0 %1072, %v394_v38   ;;  %v395_v49 = vld [vmem:[%s1361_s2 + $0x38] sm:$0xff]  ;;  %v393_v51 = vld [vmem:[%s1361_s2 + $0x28] sm:$0xff]  ;;  %vm739_vm3 = vcmask 523264  }
   0xf   : > { %s1175_s16 = scalar_lea.vmem %s1359_s0, %s1045_s13  ;;  %418 = vperm.xlu1 %1073, %v392_v39   ;;  %v1036_v63 = vld [vmem:[%s1360_s1 + $0x14] sm:$0xf]  ;;  %v436_v17 = vld [vmem:[%s1363_s4] sm:$0xff]  ;;  %v391_v20 = vld [vmem:[%s1361_s2 + $0x18] sm:$0xff]  ;;  %vm801_vm4 = vcmask 261120   ;;  %vm839_vm5 = vcmask 130048  }
  0x10   : > { %v506_v0 = vld [vmem:[%s1175_s16 + $0xe0] sm:$0xff]  ;;  %v508_v1 = vld [vmem:[%s1175_s16 + $0xf0] sm:$0xff]  ;;  %v507_v2 = vld [vmem:[%s1175_s16 + $0xe8] sm:$0xff]  ;;  %s1033_s20 = sshll.u32 %s1374_s30, 3  ;;  %vm872_vm6 = vcmask 1043456  }
  0x11   : > { %v526_v3 = vpack.c.bf16 %v508_v1, %v506_v0  ;;  %v509_v4 = vld [vmem:[%s1175_s16 + $0xf8] sm:$0xff]  ;;  %v502_v5 = vld [vmem:[%s1175_s16 + $0xc0] sm:$0xff]  ;;  %v504_v6 = vld [vmem:[%s1175_s16 + $0xd0] sm:$0xff]  ;;  %s370_s22 = scalar_lea.vmem %s1368_s9, %s1033_s20 }
  0x12   : > { %v527_v8 = vpack.c.bf16 %v509_v4, %v507_v2  ;;  %v503_v9 = vld [vmem:[%s1175_s16 + $0xc8] sm:$0xff]  ;;  %v505_v10 = vld [vmem:[%s1175_s16 + $0xd8] sm:$0xff]  ;;  %v524_v11 = vpack.c.bf16 %v504_v6, %v502_v5  ;;  %v498_v13 = vld [vmem:[%s1175_s16 + $0xa0] sm:$0xff] }
  0x13   : > { %589 = vmatpush.bf16.msra.mxu0 %v526_v3  ;;  %v525_v12 = vpack.c.bf16 %v505_v10, %v503_v9  ;;  %v500_v14 = vld [vmem:[%s1175_s16 + $0xb0] sm:$0xff]  ;;  %v499_v15 = vld [vmem:[%s1175_s16 + $0xa8] sm:$0xff]  ;;  %v501_v16 = vld [vmem:[%s1175_s16 + $0xb8] sm:$0xff] }
  0x14   : > { %647 = vmatpush.bf16.msra.mxu2 %v527_v8  ;;  %v522_v19 = vpack.c.bf16 %v500_v14, %v498_v13  ;;  %v523_v21 = vpack.c.bf16 %v501_v16, %v499_v15  ;;  %v494_v22 = vld [vmem:[%s1175_s16 + $0x80] sm:$0xff]  ;;  %v496_v23 = vld [vmem:[%s1175_s16 + $0x90] sm:$0xff]  ;;  %v511_v24 = vld [vmem:[%s1175_s16 + $0x108] sm:$0x7] }
  0x15   : > { %v495_v26 = vld [vmem:[%s1175_s16 + $0x88] sm:$0xff]  ;;  %v497_v27 = vld [vmem:[%s1175_s16 + $0x98] sm:$0xff]  ;;  %v529_v28 = vpack.c.bf16 %v511_v24, %v511_v24  ;;  %v520_v30 = vpack.c.bf16 %v496_v23, %v494_v22  ;;  %v490_v31 = vld [vmem:[%s1175_s16 + $0x60] sm:$0xff] }
  0x16   : > { %v510_v33 = vld [vmem:[%s1175_s16 + $0x100] sm:$0x7]  ;;  %v521_v34 = vpack.c.bf16 %v497_v27, %v495_v26  ;;  %v492_v35 = vld [vmem:[%s1175_s16 + $0x70] sm:$0xff]  ;;  %v491_v40 = vld [vmem:[%s1175_s16 + $0x68] sm:$0xff]  ;;  %433 = vperm.xlu0 %1072, %v395_v49  }
  0x17   : > { %590 = vmatpush.bf16.msra.mxu0 %v524_v11  ;;  %v587_v32 = vand.u32 %v582_v25, %v529_v28  ;;  %v528_v37 = vpack.c.bf16 %v510_v33, %v510_v33  ;;  %v493_v41 = vld [vmem:[%s1175_s16 + $0x78] sm:$0xff]  ;;  %v518_v43 = vpack.c.bf16 %v492_v35, %v490_v31  ;;  %v486_v45 = vld [vmem:[%s1175_s16 + $0x40] sm:$0xff]  ;;  %v488_v46 = vld [vmem:[%s1175_s16 + $0x50] sm:$0xff]  ;;  %423 = vperm.xlu1 %1073, %v393_v51  }
  0x18   : > { %648 = vmatpush.bf16.msra.mxu2 %v525_v12  ;;  %v519_v44 = vpack.c.bf16 %v493_v41, %v491_v40  ;;  %v487_v47 = vld [vmem:[%s1175_s16 + $0x48] sm:$0xff]  ;;  %v489_v48 = vld [vmem:[%s1175_s16 + $0x58] sm:$0xff]  ;;  %v516_v50 = vpack.c.bf16 %v488_v46, %v486_v45  ;;  %v482_v53 = vld [vmem:[%s1175_s16 + $0x20] sm:$0xff] }
  0x19   : > { %683 = vmatpush.bf16.msra.mxu3 %v587_v32  ;;  %v584_v42 = vand.u32 %v582_v25, %v528_v37  ;;  %v517_v52 = vpack.c.bf16 %v489_v48, %v487_v47  ;;  %v484_v54 = vld [vmem:[%s1175_s16 + $0x30] sm:$0xff]  ;;  %v483_v55 = vld [vmem:[%s1175_s16 + $0x28] sm:$0xff]  ;;  %v485_v56 = vld [vmem:[%s1175_s16 + $0x38] sm:$0xff] }
  0x1a   : > { %v514_v57 = vpack.c.bf16 %v484_v54, %v482_v53  ;;  %v515_v58 = vpack.c.bf16 %v485_v56, %v483_v55  ;;  %v478_v59 = vld [vmem:[%s1175_s16] sm:$0xff]  ;;  %v480_v60 = vld [vmem:[%s1175_s16 + $0x10] sm:$0xff]  ;;  %v479_v61 = vld [vmem:[%s1175_s16 + $0x8] sm:$0xff] }
  0x1b   : > { %591 = vmatpush.bf16.msra.mxu0 %v522_v19  ;;  %625 = vmatpush.bf16.msra.mxu1 %v584_v42  ;;  %v481_v62 = vld [vmem:[%s1175_s16 + $0x18] sm:$0xff]  ;;  %v388_v1 = vld [vmem:[%s1361_s2] sm:$0xff]  ;;  %v512_v2 = vpack.c.bf16 %v480_v60, %v478_v59  ;;  %v1035_v4 = vld [vmem:[%s1360_s1 + $0x4] sm:$0xf0] }
  0x1c   : > { %649 = vmatpush.bf16.msra.mxu2 %v523_v21  ;;  %1007 = vmatmul.msk.bf16.vlgmr.msra.gmra.mxu3 %vm566_vm2, %v978_v36  ;;  %v983_v0 = vld [vmem:[%s1360_s1 + $0x18] sm:$0xf0]  ;;  %v973_v3 = vld [vmem:[%s1360_s1] sm:$0xf]  ;;  %v389_v5 = vld [vmem:[%s1361_s2 + $0x8] sm:$0xff]  ;;  %v513_v6 = vpack.c.bf16 %v481_v62, %v479_v61 }
  0x1d   : > { %v986_v7 = vor.u32 %v1036_v63, %v983_v0  ;;  %v974_v8 = vor.u32 %v1035_v4, %v973_v3  ;;  %v1038_v9 = vld [vmem:[%s1360_s1 + $0x24] sm:$0xf]  ;;  %v991_v10 = vld [vmem:[%s1360_s1 + $0x28] sm:$0xf0]  ;;  %v981_v11 = vld [vmem:[%s1360_s1 + $0x10] sm:$0xf] }
  0x1e   : > { %1003 = vmatmul.msk.bf16.vlgmr.msra.gmra.mxu1 %vm566_vm2, %v978_v36  ;;  %398 = vperm.xlu0 %1072, %v388_v1   ;;  %v1037_v12 = vld [vmem:[%s1360_s1 + $0x14] sm:$0xf0]  ;;  %v994_v13 = vor.u32 %v1038_v9, %v991_v10  ;;  %v390_v15 = vld [vmem:[%s1361_s2 + $0x10] sm:$0xff]  ;;  %v999_v19 = vld [vmem:[%s1360_s1 + $0x38] sm:$0xf0] }
  0x1f   : > { %592 = vmatpush.bf16.msra.mxu0 %v520_v30  ;;  %403 = vperm.xlu1 %1073, %v389_v5   ;;  %v982_v14 = vor.u32 %v1037_v12, %v981_v11  ;;  %v439_v16 = vld [vmem:[%s1363_s4 + $0x18] sm:$0xff]  ;;  %v1040_v18 = vld [vmem:[%s1360_s1 + $0x34] sm:$0xf]  ;;  %v460_v21 = vld [vmem:[%s1365_s6] sm:$0xff] }
  0x20   : > { %650 = vmatpush.bf16.msra.mxu2 %v521_v34  ;;  %408 = vperm.xlu2 %1074, %v390_v15   ;;  %v461_v22 = vld [vmem:[%s1365_s6 + $0x8] sm:$0xff]  ;;  %v989_v23 = vld [vmem:[%s1360_s1 + $0x20] sm:$0xf]  ;;  %v1002_v25 = vor.u32 %v1040_v18, %v999_v19  ;;  %v438_v27 = vld [vmem:[%s1363_s4 + $0x10] sm:$0xff] }
  0x21   : > { %v1039_v24 = vld [vmem:[%s1360_s1 + $0x24] sm:$0xf0]  ;;  %v997_v29 = vld [vmem:[%s1360_s1 + $0x30] sm:$0xf]  ;;  %v1041_v30 = vld [vmem:[%s1360_s1 + $0x34] sm:$0xf0] }
  0x22   : > { %v990_v26 = vor.u32 %v1039_v24, %v989_v23  ;;  %v437_v28 = vld [vmem:[%s1363_s4 + $0x8] sm:$0xff]  ;;  %v998_v31 = vor.u32 %v1041_v30, %v997_v29  ;;  %v472_v32 = vld [vmem:[%s1367_s8] sm:$0x7] }
  0x23   : > { %593 = vmatpush.bf16.msra.mxu0 %v518_v43 }
  0x24   : > { %651 = vmatpush.bf16.msra.mxu2 %v519_v44 }
  0x26   : > { %457 = vperm.xlu0 %1072, %v439_v16  }
  0x27   : > { %594 = vmatpush.bf16.msra.mxu0 %v516_v50  ;;  %442 = vperm.xlu1 %1073, %v436_v17  }
  0x28   : > { %652 = vmatpush.bf16.msra.mxu2 %v517_v52  ;;  %413 = vperm.xlu2 %1074, %v391_v20  }
  0x2b   : > { %595 = vmatpush.bf16.msra.mxu0 %v514_v57 }
  0x2c   : > { %653 = vmatpush.bf16.msra.mxu2 %v515_v58  ;;  %1008 = vmatmul.msk.bf16.gmra.mxu3 %vm566_vm2, %v986_v7 }
  0x2e   : > { %1004 = vmatmul.msk.bf16.gmra.mxu1 %vm566_vm2, %v986_v7  ;;  %464 = vperm.xlu0 %1072, %v460_v21  }
  0x2f   : > { %596 = vmatpush.bf16.msra.mxu0 %v512_v2  ;;  %469 = vperm.xlu1 %1073, %v461_v22  }
  0x30   : > { %654 = vmatpush.bf16.msra.mxu2 %v513_v6  ;;  %452 = vperm.xlu2 %1074, %v438_v27  }
  0x32   : > { %597 = vmatmul.bf16.vlgmr.msra.gmra.mxu0 %v974_v8 }
  0x33   : > { %655 = vmatmul.bf16.vlgmr.msra.gmra.mxu2 %v974_v8 }
  0x38   : > { %447 = vperm.xlu2 %1074, %v437_v28  }
  0x3c   : > { %1009 = vmatmul.msk.bf16.gmra.mxu3 %vm566_vm2, %v994_v13 }
  0x3e   : > { %1005 = vmatmul.msk.bf16.gmra.mxu1 %vm566_vm2, %v994_v13 }
  0x40   : > { %475 = vperm.xlu2 %1074, %v472_v32  }
  0x42   : > { %602 = vmatmul.bf16.gmra.mxu0 %v982_v14 }
  0x43   : > { %660 = vmatmul.bf16.gmra.mxu2 %v982_v14 }
  0x4c   : > { %1010 = vmatmul.msk.bf16.gmra.mxu3 %vm566_vm2, %v1002_v25 }
  0x4e   : > { %1006 = vmatmul.msk.bf16.gmra.mxu1 %vm566_vm2, %v1002_v25 }
  0x52   : > { %607 = vmatmul.bf16.gmra.mxu0 %v990_v26 }
  0x53   : > { %665 = vmatmul.bf16.gmra.mxu2 %v990_v26 }
  0x62   : > { %612 = vmatmul.bf16.gmra.mxu0 %v998_v31 }
  0x63   : > { %670 = vmatmul.bf16.gmra.mxu2 %v998_v31 }
  0x7a   : > { %v409_v2 = vpop.permute.xlu2 %408 }
  0x80   : > { %v429_v33 = vpop.permute.xlu0 %428 }
  0x81   : > { %v419_v62 = vpop.permute.xlu1 %418 }
  0x82   : > { %v414_v15 = vpop.permute.xlu2 %413 }
  0x88   : > { %v1312_v35 = vpop.permute.xlu0 %433 }
  0x89   : > { %v424_v4 = vpop.permute.xlu1 %423 }
  0x90   : > { %v399_v39 = vpop.permute.xlu0 %398 }
  0x91   : > { %v404_v21 = vpop.permute.xlu1 %403 }
  0x9b   : > { %v627_v34 = vpop.f32.mrf.mxu1 }
  0x9f   : > { %v685_v36 = vpop.f32.mrf.mxu3 }
  0xa3   : > { %v1314_v37 = vpop.f32.mrf.mxu1 }
  0xa7   : > { %v1318_v42 = vpop.f32.mrf.mxu3 }
  0xab   : > { %v632_v43 = vpop.f32.mrf.mxu1 }
  0xaf   : > { %v598_v38 = vpop.f32.mrf.mxu0  ;;  %v1324_v49 = vpop.f32.mrf.mxu3 }
  0xb0   : > { %v599_v40 = vadd.f32 %v598_v38, %v399_v39 }
  0xb2   : > { %v1316_v41 = vadd.f32 %v627_v34, %v599_v40 }
  0xb3   : > { %v634_v51 = vpop.f32.mrf.mxu1 }
  0xb6   : > { %v656_v44 = vpop.f32.mrf.mxu2 }
  0xb7   : > { %v657_v45 = vadd.f32 %v656_v44, %v399_v39  ;;  %v600_v46 = vpop.f32.mrf.mxu0  ;;  %v692_v54 = vpop.f32.mrf.mxu3 }
  0xb8   : > { %v601_v24 = vadd.f32 %v600_v46, %v404_v21 }
  0xb9   : > { %v1320_v47 = vadd.f32 %v685_v36, %v657_v45 }
  0xba   : > { %v630_v44 = vadd.f32 %v1314_v37, %v601_v24  ;;  %v1044_v24 = vld [vmem:[%s1364_s5] sm:$0xff] }
  0xbb   : > { %v637_v55 = vpop.f32.mrf.mxu1 }
  0xbe   : > { %v1322_v48 = vpop.f32.mrf.mxu2 }
  0xbf   : > { %v603_v50 = vpop.f32.mrf.mxu0  ;;  %v695_v58 = vpop.f32.mrf.mxu3 }
  0xc0   : > { %v604_v14 = vadd.f32 %v603_v50, %v409_v2 }
  0xc2   : > { %v633_v25 = vadd.f32 %v632_v43, %v604_v14 }
  0xc3   : > { %v639_v59 = vpop.f32.mrf.mxu1 }
  0xc4   : > { %v709_v46 = vmax.f32 %v633_v25, 0.0 }
  0xc6   : > { %v661_v52 = vpop.f32.mrf.mxu2 }
  0xc7   : > { %v605_v53 = vpop.f32.mrf.mxu0  ;;  %v697_v63 = vpop.f32.mrf.mxu3  ;;  %v662_v50 = vadd.f32 %v661_v52, %v409_v2 }
  0xc8   : > { %v606_v16 = vadd.f32 %v605_v53, %v414_v15 }
  0xca   : > { %v635_v27 = vadd.f32 %v634_v51, %v606_v16 }
  0xcb   : > { %v642_v0 = vpop.f32.mrf.mxu1 }
  0xcc   : > { %v711_v43 = vmax.f32 %v635_v27, 0.0 }
  0xce   : > { %v663_v56 = vpop.f32.mrf.mxu2 }
  0xcf   : > { %v608_v57 = vpop.f32.mrf.mxu0  ;;  %v700_v8 = vpop.f32.mrf.mxu3  ;;  %v664_v39 = vadd.f32 %v663_v56, %v414_v15  ;;  %v705_v56 = vmax.f32 %v1316_v41, 0.0 }
  0xd0   : > { %v609_v6 = vadd.f32 %v608_v57, %v419_v62  ;;  %v659_v57 = vadd.f32 %v1322_v48, %v404_v21  ;;  %v1042_v48 = vld [vmem:[%s1362_s3] sm:$0xff]  ;;  %v443_v15 = vpop.permute.xlu1 %442 }
  0xd2   : > { %v638_v17 = vadd.f32 %v637_v55, %v609_v6  ;;  %v688_v52 = vadd.f32 %v1318_v42, %v659_v57  ;;  %v1043_v42 = vld [vmem:[%s1362_s3 + $0x8] sm:$0xff] }
  0xd3   : > { %v644_v11 = vpop.f32.mrf.mxu1 }
  0xd4   : > { %v713_v28 = vmax.f32 %v638_v17, 0.0  ;;  %v708_v41 = vmax.f32 %v688_v52, 0.0 }
  0xd6   : > { %v666_v60 = vpop.f32.mrf.mxu2 }
  0xd7   : > { %v610_v61 = vpop.f32.mrf.mxu0  ;;  %v667_v32 = vadd.f32 %v666_v60, %v419_v62  ;;  %v702_v38 = vpop.f32.mrf.mxu3  ;;  %v707_v62 = vmax.f32 %v630_v44, 0.0 }
  0xd8   : > { %v611_v7 = vadd.f32 %v610_v61, %v424_v4  ;;  %v723_v61 = vpack.c.bf16 %v711_v43, %v709_v46  ;;  %v470_v44 = vpop.permute.xlu1 %469 }
  0xd9   : > { %v696_v51 = vadd.f32 %v695_v58, %v667_v32 }
  0xda   : > { %v640_v18 = vadd.f32 %v639_v59, %v611_v7  ;;  %v693_v59 = vadd.f32 %v692_v54, %v664_v39  ;;  %v453_v7 = vpop.permute.xlu2 %452 }
  0xdb   : > { %v714_v37 = vmax.f32 %v696_v51, 0.0 }
  0xdc   : > { %v715_v29 = vmax.f32 %v640_v18, 0.0  ;;  %v712_v58 = vmax.f32 %v693_v59, 0.0 }
  0xde   : > { %v668_v1 = vpop.f32.mrf.mxu2  ;;  %v725_v45 = vpack.c.bf16 %v715_v29, %v713_v28 }
  0xdf   : > { %v613_v3 = vpop.f32.mrf.mxu0  ;;  %v669_v26 = vadd.f32 %v668_v1, %v424_v4  ;;  %v721_v1 = vpack.c.bf16 %v707_v62, %v705_v56 }
  0xe0   : > { %v614_v5 = vadd.f32 %v613_v3, %v429_v33 }
  0xe1   : > { %v698_v40 = vadd.f32 %v697_v63, %v669_v26  ;;  %v691_v63 = vadd.f32 %v1324_v49, %v662_v50  ;;  %v706_v49 = vmax.f32 %v1320_v47, 0.0 }
  0xe2   : > { %v643_v12 = vadd.f32 %v642_v0, %v614_v5  ;;  %v448_v47 = vpop.permute.xlu2 %447 }
  0xe3   : > { %v716_v60 = vmax.f32 %v698_v40, 0.0  ;;  %v710_v2 = vmax.f32 %v691_v63, 0.0  ;;  %v722_v3 = vpack.c.bf16 %v708_v41, %v706_v49 }
  0xe4   : > { %v717_v22 = vmax.f32 %v643_v12, 0.0 }
  0xe5   : > { %v726_v0 = vpack.c.bf16 %v716_v60, %v714_v37  ;;  %v724_v54 = vpack.c.bf16 %v712_v58, %v710_v2 }
  0xe6   : > { %v671_v9 = vpop.f32.mrf.mxu2 }
  0xe7   : > { %v615_v10 = vpop.f32.mrf.mxu0  ;;  %v672_v20 = vadd.f32 %v671_v9, %v429_v33 }
  0xe8   : > { %v616_v13 = vadd.f32 %v615_v10, %v1312_v35  ;;  %v458_v10 = vpop.permute.xlu0 %457 }
  0xe9   : > { %v701_v34 = vadd.f32 %v700_v8, %v672_v20 }
  0xea   : > { %v645_v19 = vadd.f32 %v644_v11, %v616_v13  ;;  %v476_v37 = vpop.permute.xlu2 %475 }
  0xeb   : > { %v718_v53 = vmax.f32 %v701_v34, 0.0 }
  0xec   : > { %v719_v23 = vmax.f32 %v645_v19, 0.0 }
  0xee   : > { %v673_v30 = vpop.f32.mrf.mxu2  ;;  %v727_v31 = vpack.c.bf16 %v719_v23, %v717_v22 }
  0xef   : > { %v674_v36 = vadd.f32 %v673_v30, %v1312_v35 }
  0xf0   : > { %750 = vmatpush.bf16.msrb.mxu1 %v727_v31  ;;  %v465_v40 = vpop.permute.xlu0 %464 }
  0xf1   : > { %v703_v33 = vadd.f32 %v702_v38, %v674_v36 }
  0xf3   : > { %v720_v55 = vmax.f32 %v703_v33, 0.0 }
  0xf4   : > { %751 = vmatpush.bf16.msrb.mxu1 %v725_v45 }
  0xf5   : > { %v728_v35 = vpack.c.bf16 %v720_v55, %v718_v53  ;;  %v387_v53 = vld [vmem:[%s1366_s7] sm:$0x3] }
  0xf7   : > { %769 = vmatpush.bf16.msrb.mxu3 %v728_v35 }
  0xf8   : > { %752 = vmatpush.bf16.msrb.mxu1 %v723_v61 }
  0xfb   : > { %770 = vmatpush.bf16.msrb.mxu3 %v726_v0 }
  0xfc   : > { %753 = vmatpush.bf16.msrb.mxu1 %v721_v1 }
  0xff   : > { %771 = vmatpush.bf16.msrb.mxu3 %v724_v54  ;;  %1019 = vmatmul.msk.bf16.vlgmr.msrb.gmra.mxu1 %vm739_vm3, %v1042_v48 }
 0x103   : > { %772 = vmatpush.bf16.msrb.mxu3 %v722_v3 }
 0x106   : > { %1021 = vmatmul.msk.bf16.vlgmr.msrb.gmra.mxu3 %vm739_vm3, %v1042_v48 }
 0x10f   : > { %1020 = vmatmul.msk.bf16.gmra.mxu1 %vm739_vm3, %v1043_v42 }
 0x116   : > { %1022 = vmatmul.msk.bf16.gmra.mxu3 %vm739_vm3, %v1043_v42 }
 0x17c   : > { %v755_v4 = vpop.f32.mrf.mxu1 }
 0x17d   : > { %v756_v16 = vadd.f32 %v755_v4, %v443_v15 }
 0x17f   : > { %v784_v22 = vmax.f32 %v756_v16, 0.0 }
 0x184   : > { %v757_v5 = vpop.f32.mrf.mxu1 }
 0x185   : > { %v758_v13 = vadd.f32 %v757_v5, %v448_v47 }
 0x187   : > { %v786_v19 = vmax.f32 %v758_v13, 0.0 }
 0x189   : > { %v774_v6 = vpop.f32.mrf.mxu3  ;;  %v792_v23 = vpack.c.bf16 %v786_v19, %v784_v22 }
 0x18a   : > { %v775_v29 = vadd.f32 %v774_v6, %v443_v15 }
 0x18c   : > { %v760_v8 = vpop.f32.mrf.mxu1  ;;  %v785_v36 = vmax.f32 %v775_v29, 0.0 }
 0x18d   : > { %v761_v11 = vadd.f32 %v760_v8, %v453_v7 }
 0x18f   : > { %v788_v17 = vmax.f32 %v761_v11, 0.0 }
 0x191   : > { %v776_v9 = vpop.f32.mrf.mxu3 }
 0x192   : > { %v777_v27 = vadd.f32 %v776_v9, %v448_v47 }
 0x194   : > { %v762_v12 = vpop.f32.mrf.mxu1  ;;  %v787_v32 = vmax.f32 %v777_v27, 0.0 }
 0x195   : > { %v763_v14 = vadd.f32 %v762_v12, %v458_v10 }
 0x196   : > { %v793_v38 = vpack.c.bf16 %v787_v32, %v785_v36 }
 0x197   : > { %v790_v18 = vmax.f32 %v763_v14, 0.0 }
 0x199   : > { %v779_v20 = vpop.f32.mrf.mxu3  ;;  %v794_v21 = vpack.c.bf16 %v790_v18, %v788_v17 }
 0x19a   : > { %v780_v25 = vadd.f32 %v779_v20, %v453_v7 }
 0x19b   : > { %811 = vmatpush.bf16.msrb.mxu0 %v794_v21 }
 0x19c   : > { %v789_v30 = vmax.f32 %v780_v25, 0.0 }
 0x19f   : > { %812 = vmatpush.bf16.msrb.mxu0 %v792_v23 }
 0x1a1   : > { %v781_v26 = vpop.f32.mrf.mxu3 }
 0x1a2   : > { %v782_v28 = vadd.f32 %v781_v26, %v458_v10  ;;  %1027 = vmatmul.msk.bf16.vlgmr.msrb.gmra.mxu0 %vm801_vm4, %v1044_v24 }
 0x1a4   : > { %v791_v31 = vmax.f32 %v782_v28, 0.0 }
 0x1a6   : > { %v795_v34 = vpack.c.bf16 %v791_v31, %v789_v30 }
 0x1a8   : > { %825 = vmatpush.bf16.msrb.mxu2 %v795_v34 }
 0x1ac   : > { %826 = vmatpush.bf16.msrb.mxu2 %v793_v38 }
 0x1af   : > { %1028 = vmatmul.msk.bf16.vlgmr.msrb.gmra.mxu2 %vm801_vm4, %v1044_v24 }
 0x21f   : > { %v814_v39 = vpop.f32.mrf.mxu0 }
 0x220   : > { %v815_v33 = vadd.f32 %v814_v39, %v465_v40 }
 0x222   : > { %v833_v43 = vmax.f32 %v815_v33, 0.0 }
 0x227   : > { %v816_v45 = vpop.f32.mrf.mxu0 }
 0x228   : > { %v817_v46 = vadd.f32 %v816_v45, %v470_v44 }
 0x22a   : > { %v835_v50 = vmax.f32 %v817_v46, 0.0 }
 0x22c   : > { %v837_v51 = vpack.c.bf16 %v835_v50, %v833_v43 }
 0x22e   : > { %850 = vmatpush.bf16.msra.mxu1 %v837_v51 }
 0x231   : > { %1029 = vmatmul.msk.bf16.vlgmr.msra.gmra.mxu1 %vm839_vm5, %v387_v53 }
 0x232   : > { %v828_v55 = vpop.f32.mrf.mxu2 }
 0x233   : > { %v829_v57 = vadd.f32 %v828_v55, %v465_v40 }
 0x235   : > { %v834_v35 = vmax.f32 %v829_v57, 0.0 }
 0x23a   : > { %v830_v59 = vpop.f32.mrf.mxu2 }
 0x23b   : > { %v831_v60 = vadd.f32 %v830_v59, %v470_v44 }
 0x23d   : > { %v836_v61 = vmax.f32 %v831_v60, 0.0 }
 0x23f   : > { %v838_v56 = vpack.c.bf16 %v836_v61, %v834_v35 }
 0x241   : > { %863 = vmatpush.bf16.msra.mxu3 %v838_v56 }
 0x244   : > { %1030 = vmatmul.msk.bf16.vlgmr.msra.gmra.mxu3 %vm839_vm5, %v387_v53 }
 0x2ae   : > { %v852_v62 = vpop.f32.mrf.mxu1 }
 0x2af   : > { %v853_v0 = vadd.f32 %v852_v62, %v476_v37 }
 0x2b6   : > { %v854_v63 = vpop.f32.mrf.mxu1 }
 0x2c7   : > { %v865_v52 = vpop.f32.mrf.mxu3 }
 0x2c8   : > { %v866_v58 = vadd.f32 %v865_v52, %v476_v37 }
 0x2ca   : > { %v871_v1 = vrot.slane %v866_v58, 4 }
 0x2cc   : > { %v873_v2 = vsel %vm872_vm6, %v853_v0, %v871_v1 }
 0x2cd   : > { %875 = vst [vmem:[%s370_s22] sm:$0x77] %v873_v2 }
 0x2cf   : > { %v867_v48 = vpop.f32.mrf.mxu3 }
 0x2d0 PF: > { %s19_s11 = sadd.s32 1, %s1097_s11   ;;  %s1369_s30 = smov %s1093_s10 }
 0x2d1   : > { %p16_p5 = scmp.ge.s32.totalorder %s19_s11, 4   ;;  %s1370_s10 = smov %s1372_s12 }
 0x2d3   :  { %18 = sbr.rel (!%p16_p5) target bundleno = 2 (0x2), region = 86 }

</bundles_post_ra>
